<compile_context>
chip_gen: v5e
topology: v5e:2x2
jax: 0.10.0
libtpu: 0.0.40
codegen_flags: <defaults>
</compile_context>

<pallas_src>
import math

import jax
import jax.numpy as jnp
from jax.experimental import pallas as pl
from jax.experimental.pallas import tpu as pltpu

HIGHWAY_BIAS = -2.0  # the module's constant `bias=-2`


def _make_highway_kernel(tn):
    def kernel(x_row_ref, t_ref, w_ref, b_ref, o_ref):
        """One (feature-tile j [outer], batch-tile i [inner]) grid step.

        x_row_ref: [TB, H]  full input rows (matmul K dim + combine source)
        t_ref:     [TB, TN] transformed slice
        w_ref:     [H, TN]  bf16 weight tile, pre-transposed on host; block
                            index depends only on j -> resident across the
                            inner batch loop (fetched once per feature tile)
        b_ref:     [1, TN]  gate bias tile with the -2 highway constant folded
        o_ref:     [TB, TN] output tile
        """
        j = pl.program_id(0)  # feature-tile axis (outer)

        # Gate logits on the MXU: bf16 inputs, f32 accumulate. Standard (1,0)
        # contraction (weight was transposed on the host -> no XLU transpose).
        z = jnp.dot(
            x_row_ref[...].astype(jnp.bfloat16),
            w_ref[...],
            preferred_element_type=jnp.float32,
        ) + b_ref[...]

        # Exact sigmoid with a single EUP transcendental (tanh form).
        tg = 0.5 * jnp.tanh(0.5 * z) + 0.5

        # Input slice for the highway combine, reused from the resident
        # (TB, H) x-row tile instead of a second HBM stream of `input`.
        x = x_row_ref[:, pl.ds(pl.multiple_of(j * tn, tn), tn)].astype(jnp.float32)
        t = t_ref[...].astype(jnp.float32)

        # Highway combine rewritten as x + tg*(t - x).
        o_ref[...] = (x + tg * (t - x)).astype(o_ref.dtype)

    return kernel


def highway_forward(transformed, inp, weight, bias, *, block_b=256,
                    vmem_budget_bytes=36 << 20):
    """transformed, inp: [B, H]; weight: [H, H] (PyTorch [out, in] layout);
    bias: [H].  Highway combine requires output_size == input_size."""
    B, H = inp.shape
    assert transformed.shape == (B, H)
    assert weight.shape == (H, H), "highway combine requires input_size == output_size"
    assert bias.shape == (H,)

    act_bytes = jnp.dtype(inp.dtype).itemsize
    w_bytes = 2  # weight is streamed as bf16

    # ---- batch tile (sublane-aligned; multiples of 256 ideal for MXU) -------
    TB = min(B, block_b)
    # v7x megacore guard: avoid a single-step "parallel" batch axis when B allows.
    if TB == B and B >= 16 and B % 16 == 0:
        TB = B // 2
    assert B % TB == 0 and (TB % 8 == 0 or TB == B), \
        "B must tile in multiples of 8"

    # ---- feature tile: prefer TN = H so the weight is streamed exactly once ---
    def footprint(tn):
        # Double-buffered per-step VMEM: x rows + weight tile + transformed
        # tile + bias tile + output tile.
        return 2 * (TB * H * act_bytes + H * tn * w_bytes
                    + 2 * TB * tn * act_bytes + tn * 4)

    TN = H
    while (footprint(TN) > vmem_budget_bytes and TN % 2 == 0
           and (TN // 2) % 128 == 0 and H % (TN // 2) == 0):
        TN //= 2
    assert H % TN == 0 and (TN % 128 == 0 or TN == H), \
        "H must tile in multiples of 128"

    # Feature tiles outer, batch tiles inner: weight block index is constant
    # across the inner loop -> weight resident, total weight HBM traffic = H*H.
    grid = (H // TN, B // TB)

    # ---- host-side prep (once per call) --------------------------------------
    # Pre-transpose + cast the weight (one H^2 bf16 copy, amortized over the
    # whole grid) so the kernel avoids any in-kernel transpose.
    w_t = weight.astype(jnp.bfloat16).T            # [in, out] = [H, H]
    # Fold the constant highway bias (-2) into the linear bias.
    b2d = (bias.astype(jnp.float32) + HIGHWAY_BIAS).reshape(1, H)

    n_feat_tiles = H // TN
    cost = pl.CostEstimate(
        flops=2 * B * H * H,
        transcendentals=B * H,
        bytes_accessed=int(H * H * w_bytes                     # weight: exactly once
                           + B * H * act_bytes * n_feat_tiles  # x rows: once per feature tile
                           + B * H * act_bytes                 # transformed: once
                           + B * H * act_bytes                 # output: once
                           + H * 4),                           # folded bias
    )

    # Explicit scoped-VMEM limit: raises v5e's 16 MiB default, stays <= 48 MiB
    # so it leaves headroom under v7x's 64 MiB physical VMEM.
    vmem_limit = int(min(48 << 20, max(16 << 20, footprint(TN) + (4 << 20))))

    return pl.pallas_call(
        _make_highway_kernel(TN),
        out_shape=jax.ShapeDtypeStruct((B, H), inp.dtype),
        grid_spec=pltpu.PrefetchScalarGridSpec(
            num_scalar_prefetch=0,
            grid=grid,
            in_specs=[
                # Full input rows (matmul K dim + combine); depends only on i.
                pl.BlockSpec((TB, H), lambda j, i: (i, 0)),
                # Transformed slice for this (i, j) tile.
                pl.BlockSpec((TB, TN), lambda j, i: (i, j)),
                # bf16 weight tile [H, TN]; depends only on the outer axis j
                # -> resident across the inner batch loop.
                pl.BlockSpec((H, TN), lambda j, i: (0, j)),
                # Folded bias tile.
                pl.BlockSpec((1, TN), lambda j, i: (0, j)),
            ],
            out_specs=pl.BlockSpec((TB, TN), lambda j, i: (i, j)),
        ),
        compiler_params=pltpu.CompilerParams(
            dimension_semantics=("arbitrary", "parallel"),
            vmem_limit_bytes=vmem_limit,
        ),
        cost_estimate=cost,
    )(inp, transformed, w_t, b2d)


def highway_reference(transformed, inp, weight, bias):
    """Exact f32 semantics of the PyTorch module."""
    tg = jax.nn.sigmoid(inp @ weight.T + bias + HIGHWAY_BIAS)
    return tg * transformed + (1.0 - tg) * inp


def highway_reference_bf16_gate(transformed, inp, weight, bias):
    """Reference with the kernel's gate-matmul numerics (bf16 in, f32 acc)."""
    z = jnp.dot(inp.astype(jnp.bfloat16), weight.astype(jnp.bfloat16).T,
                preferred_element_type=jnp.float32)
    tg = jax.nn.sigmoid(z + bias + HIGHWAY_BIAS)
    return tg * transformed + (1.0 - tg) * inp


if __name__ == "__main__":
    key = jax.random.PRNGKey(0)
    k_x, k_t, k_w, k_b = jax.random.split(key, 4)

    B, H = 32, 256  # small demo shapes; input_size == output_size = 256

    inp = jax.random.normal(k_x, (B, H), dtype=jnp.float32)
    transformed = jax.random.normal(k_t, (B, H), dtype=jnp.float32)

    # Deterministic nn.Linear-style init: U(-1/sqrt(H), 1/sqrt(H))
    bound = 1.0 / math.sqrt(H)
    weight = jax.random.uniform(k_w, (H, H), minval=-bound, maxval=bound,
                                dtype=jnp.float32)
    bias = jax.random.uniform(k_b, (H,), minval=-bound, maxval=bound,
                              dtype=jnp.float32)

    out = jax.block_until_ready(highway_forward(transformed, inp, weight, bias))

    # Tight check against a reference with matching gate numerics
    # (bf16 MXU inputs, f32 accumulation, exact sigmoid).
    ref_m = highway_reference_bf16_gate(transformed, inp, weight, bias)
    err_m = float(jnp.max(jnp.abs(out - ref_m)))
    assert jnp.allclose(out, ref_m, atol=1e-3, rtol=1e-3), \
        f"mismatch vs matched-numerics reference: {err_m}"

    # Looser sanity check against the exact f32 module semantics (the only
    # difference is the bf16 cast of the gate-matmul inputs).
    ref = highway_reference(transformed, inp, weight, bias)
    err = float(jnp.max(jnp.abs(out - ref)))
    assert jnp.allclose(out, ref, atol=5e-2, rtol=5e-2), \
        f"mismatch vs f32 reference: {err}"

    print("KERNEL_OK")
</pallas_src>

<mosaic_0001>
module attributes {stable_mosaic.version = 11 : i64} {
  func.func @kernel(%arg0: i32, %arg1: i32, %arg2: memref<16x256xf32, #tpu.memory_space<vmem>>, %arg3: memref<16x256xf32, #tpu.memory_space<vmem>>, %arg4: memref<256x256xbf16, #tpu.memory_space<vmem>>, %arg5: memref<1x256xf32, #tpu.memory_space<vmem>>, %arg6: memref<16x256xf32, #tpu.memory_space<vmem>>) attributes {dimension_semantics = [#tpu.dimension_semantics<arbitrary>, #tpu.dimension_semantics<parallel>], iteration_bounds = array<i64: 1, 2>, scalar_prefetch = 0 : i64, scratch_operands = 0 : i64, tpu.core_type = #tpu.core_type<tc>, window_params = [{transform_indices = @transform_0, window_bounds = array<i64: 16, 256>}, {transform_indices = @transform_1, window_bounds = array<i64: 16, 256>}, {transform_indices = @transform_2, window_bounds = array<i64: 256, 256>}, {transform_indices = @transform_3, window_bounds = array<i64: 1, 256>}, {transform_indices = @transform_4, window_bounds = array<i64: 16, 256>}]} {
    %c0 = arith.constant 0 : index
    %c0_0 = arith.constant 0 : index
    %0 = vector.load %arg2[%c0, %c0_0] : memref<16x256xf32, #tpu.memory_space<vmem>>, vector<16x256xf32>
    %1 = arith.truncf %0 : vector<16x256xf32> to vector<16x256xbf16>
    %c0_1 = arith.constant 0 : index
    %c0_2 = arith.constant 0 : index
    %2 = vector.load %arg4[%c0_1, %c0_2] : memref<256x256xbf16, #tpu.memory_space<vmem>>, vector<256x256xbf16>
    %cst = arith.constant dense<0.000000e+00> : vector<16x256xf32>
    %3 = tpu.matmul %1, %2, %cst {dimension_numbers = #tpu.dot_dimension_numbers<[1], [0], [0], [1], [0, 0, 1, 1], [], []>} : vector<16x256xbf16>, vector<256x256xbf16>, vector<16x256xf32> -> vector<16x256xf32>
    %c0_3 = arith.constant 0 : index
    %c0_4 = arith.constant 0 : index
    %4 = vector.load %arg5[%c0_3, %c0_4] : memref<1x256xf32, #tpu.memory_space<vmem>>, vector<1x256xf32>
    %5 = vector.broadcast %4 : vector<1x256xf32> to vector<16x256xf32>
    %6 = arith.addf %3, %5 : vector<16x256xf32>
    %cst_5 = arith.constant 5.000000e-01 : f32
    %7 = vector.broadcast %cst_5 : f32 to vector<16x256xf32>
    %8 = arith.mulf %7, %6 : vector<16x256xf32>
    %9 = math.tanh %8 : vector<16x256xf32>
    %cst_6 = arith.constant 5.000000e-01 : f32
    %10 = vector.broadcast %cst_6 : f32 to vector<16x256xf32>
    %11 = arith.mulf %10, %9 : vector<16x256xf32>
    %cst_7 = arith.constant 5.000000e-01 : f32
    %12 = vector.broadcast %cst_7 : f32 to vector<16x256xf32>
    %13 = arith.addf %11, %12 : vector<16x256xf32>
    %c256_i32 = arith.constant 256 : i32
    %14 = arith.muli %arg0, %c256_i32 : i32
    %15 = tpu.assume_multiple %14, 256 : i32
    %c0_8 = arith.constant 0 : index
    %16 = arith.index_cast %15 : i32 to index
    %17 = vector.load %arg2[%c0_8, %16] : memref<16x256xf32, #tpu.memory_space<vmem>>, vector<16x256xf32>
    %c0_9 = arith.constant 0 : index
    %c0_10 = arith.constant 0 : index
    %18 = vector.load %arg3[%c0_9, %c0_10] : memref<16x256xf32, #tpu.memory_space<vmem>>, vector<16x256xf32>
    %19 = arith.subf %18, %17 : vector<16x256xf32>
    %20 = arith.mulf %13, %19 : vector<16x256xf32>
    %21 = arith.addf %17, %20 : vector<16x256xf32>
    %c0_11 = arith.constant 0 : index
    %c0_12 = arith.constant 0 : index
    %22 = vector.load %arg6[%c0_11, %c0_12] : memref<16x256xf32, #tpu.memory_space<vmem>>, vector<16x256xf32>
    tpu.vector_store %arg6[%c0_11, %c0_12], %21 {strides = array<i32>} : memref<16x256xf32, #tpu.memory_space<vmem>>, vector<16x256xf32>,
    return
  }
  func.func @transform_0(%arg0: i32, %arg1: i32) -> (i32, i32) {
    %c0_i32 = arith.constant 0 : i32
    %c0_i32_0 = arith.constant 0 : i32
    return %arg1, %c0_i32 : i32, i32
  }
  func.func @transform_1(%arg0: i32, %arg1: i32) -> (i32, i32) {
    %c0_i32 = arith.constant 0 : i32
    return %arg1, %arg0 : i32, i32
  }
  func.func @transform_2(%arg0: i32, %arg1: i32) -> (i32, i32) {
    %c0_i32 = arith.constant 0 : i32
    %c0_i32_0 = arith.constant 0 : i32
    return %c0_i32, %arg0 : i32, i32
  }
  func.func @transform_3(%arg0: i32, %arg1: i32) -> (i32, i32) {
    %c0_i32 = arith.constant 0 : i32
    %c0_i32_0 = arith.constant 0 : i32
    return %c0_i32, %arg0 : i32, i32
  }
  func.func @transform_4(%arg0: i32, %arg1: i32) -> (i32, i32) {
    %c0_i32 = arith.constant 0 : i32
    return %arg1, %arg0 : i32, i32
  }
}

</mosaic_0001>

<bundles_post_ra>
// kernel: tpu_custom_call.1
= control target key start
LH: loop header
LB: loop body
LE: loop exit
PB: predicated region body
PF: predicated region fallthrough
CT: control target
= control target key end

     0   :  { %s1474_s0 = inlined_call_operand.hbm [shape: f32[32,256], index: 0, kind: input, shape index: {}]   ;;  %s1475_s1 = inlined_call_operand.hbm [shape: f32[32,256], index: 1, kind: input, shape index: {}]   ;;  %s1476_s2 = inlined_call_operand.hbm [shape: bf16[256,256], index: 2, kind: input, shape index: {}]   ;;  %s1477_s3 = inlined_call_operand.vmem [shape: f32[1,256], index: 3, kind: input, shape index: {}]   ;;  %s1478_s4 = inlined_call_operand.hbm [shape: f32[32,256], index: 4, kind: output, shape index: {}]  }
   0x1   :  { %1482 = sst [smem:[#allocation17_spill]] %s1476_s2 }
   0x2   :  { %9 = vsyncpa [#allocation3], 0 }
   0x3   :  { %11 = vsyncpa [#allocation3 + $0x1], 0 }
   0x4   :  { %12 = vsyncpa [#allocation6], 0 }
   0x5   :  { %14 = vsyncpa [#allocation6 + $0x1], 0 }
   0x6   :  { %15 = vsyncpa [#allocation4], 0 }
   0x7   :  { %17 = vsyncpa [#allocation4 + $0x1], 0  ;;  %s1285_s15 = smov 0   ;;  %s1287_s16 = smov 0  }
   0x8   :  { %s1289_s17 = smov 0   ;;  %s1291_s18 = smov 0  }
   0x9   :  { %s1293_s19 = smov 0   ;;  %s1295_s20 = smov 0  }
   0xa LB: > { %1483 = sst [smem:[#allocation13_spill]] %s1239_s17  ;;  %s1316_s21 = sadd.s32 4294967295, %s1251_s20   ;;  %s1251_s20 = sphi %s1295_s20, %s23_s20   ;;  %s1247_s19 = sphi %s1293_s19, %s1499_s19   ;;  %s1243_s18 = sphi %s1291_s18, %s1495_s18   ;;  %s1239_s17 = sphi %s1289_s17, %s1494_s17   ;;  %s1235_s16 = sphi %s1287_s16, %s1498_s16   ;;  %s1231_s15 = sphi %s1285_s15, %s1497_s15  }
   0xb   : > { %1484 = sst [smem:[#allocation14_spill]] %s1247_s19  ;;  %s789_s22 = sadd.s32 4294967294, %s1251_s20  }
   0xc   : > { %p55_p0 = scmp.ne.s32.totalorder %s1235_s16, %s1231_s15  ;;  %p56_p1 = scmp.eq.s32.totalorder %s1316_s21, 0 }
   0xd   : > { %p161_p2 = scmp.eq.s32.totalorder %s1316_s21, 1  ;;  %p167_p3 = scmp.eq.s32.totalorder %s789_s22, 1 }
   0xe   : > { %p1325_p4 = por %p56_p1, %p55_p0  ;;  %p790_p5 = scmp.ge.s32.totalorder %s1251_s20, 1 }
   0xf   : > { %p1330_p6 = por %p167_p3, %p55_p0  ;;  %p174_p7 = scmp.lt.s32.totalorder %s1251_s20, 3 }
  0x10   : > { %s1487_s2 = sld [smem:[#allocation17_spill]]  ;;  %s1253_s29 = smov [#allocation7]  }
  0x11   : > { %p1338_p8 = pnand %p790_p5, %p174_p7  ;;  %s190_s30 = sshll.u32 %s1253_s29, 4  ;;  %s191_s30 = int_to_ptr.vmem [resolvable:$true] %s190_s30 }
  0x12   : > { %p793_p11 = scmp.ge.s32.totalorder %s1251_s20, 2  ;;  %s1254_s5 = smov 128  }
  0x13   : > { %p989_p9 = pneg %p1338_p8  ;;  %s1255_s6 = smov 8  }
  0x14   : > { %s32_s7 = sadd.s32 1, %s1247_s19  ;;  %s42_s8 = sadd.s32 1, %s1239_s17 }
  0x15   : > { %p990_p10 = pnand %p989_p9, %p56_p1  ;;  %p33_p12 = scmp.ge.s32.totalorder %s32_s7, 2 }
  0x16   : > { %s188_s27 = sshll.u32 %s1487_s2, 4  ;;  %p49_p13 = scmp.ne.s32.totalorder %s1239_s17, %s1235_s16  ;;  %s189_s27 = int_to_ptr.hbm [resolvable:$true] %s188_s27 }
  0x17   : > { %992 = dma.hbm_to_vmem [thread:$0]  (!%p990_p10), %s189_s27, 4096, %s191_s30, [#allocation6], %s1254_s5, %s1254_s5, %s1255_s6  }
  0x18   : > { %p50_p0 = scmp.eq.s32.totalorder %s1251_s20, 0  ;;  %s1501_s7 = smov (%p33_p12, %s32_s7), 0 }
  0x19   : > { %1489 = sst [smem:[#allocation15_spill]] %s1501_s7  ;;  %p1360_p5 = por %p161_p2, %p49_p13 }
  0x1a   : > { %p1354_p3 = por %p50_p0, %p49_p13  ;;  %s39_s11 = ssub.s32 %s1247_s19, %s1501_s7 }
  0x1b   : > { %p1005_p7 = scmp.lt.s32.totalorder %s1251_s20, 2  ;;  %p40_p9 = scmp.eq.s32.totalorder %s39_s11, 0 }
  0x1c   : > { %s212_s12 = sand.u32 1, %s1239_s17   ;;  %s942_s22 = sshll.u32 %s1247_s19, 5 }
  0x1d   : > { %s794_s13 = sshll.u32 %s212_s12, 5  ;;  %s222_s27 = scalar_lea.hbm %s1474_s0, %s942_s22 }
  0x1e   : > { %s1369_s14 = scalar_select %p40_p9, %s1239_s17, %s42_s8  }
  0x1f   : > { %s216_s29 = scalar_lea.vmem [#allocation2], %s794_s13  ;;  %s223_s5 = sshll.u32 %s222_s27, 4  ;;  %s224_s5 = int_to_ptr.hbm [resolvable:$true] %s223_s5 }
  0x20   : > { %1492 = sst [smem:[#allocation16_spill]] %s1369_s14  ;;  %s225_s30 = sshll.u32 %s216_s29, 4  ;;  %s226_s30 = int_to_ptr.vmem [resolvable:$true] %s225_s30 }
  0x21   : > { %p994_p2 = pnand %p1005_p7, %p1354_p3  ;;  %s213_s6 = scalar_lea.sflag [#allocation3], %s212_s12 }
  0x22   : > { %s1256_s2 = smov 256   ;;  %s1257_s11 = smov 16  }
  0x23   : > { %996 = dma.hbm_to_vmem [thread:$0]  (!%p994_p2), %s224_s5, 512, %s226_s30, %s213_s6, %s1256_s2, %s1256_s2, %s1257_s11  }
  0x24   : > { %s247_s19 = scalar_lea.hbm %s1475_s1, %s942_s22  ;;  %s239_s14 = scalar_lea.vmem [#allocation5], %s794_s13 }
  0x25   : > { %s250_s17 = sshll.u32 %s239_s14, 4  ;;  %s248_s25 = sshll.u32 %s247_s19, 4  ;;  %s251_s17 = int_to_ptr.vmem [resolvable:$true] %s250_s17  ;;  %s249_s25 = int_to_ptr.hbm [resolvable:$true] %s248_s25 }
  0x26   : > { %s235_s26 = sand.u32 1, %s1251_s20   ;;  %262 = sbr.rel (%p1338_p8) target bundleno = 250 (0xfa), region = 36 }
  0x27   : > { %s236_s29 = scalar_lea.sflag [#allocation6], %s235_s26  ;;  %s1384_s9 = sand.u32 (!%p1338_p8), 1, %s1235_s16  }
  0x28   : > { %999 = dma.hbm_to_vmem [thread:$0]  (!%p994_p2), %s249_s25, 512, %s251_s17, %s236_s29, %s1256_s2, %s1256_s2, %s1257_s11  }
  0x29   : > { %s1387_s12 = sshll.u32 (!%p1338_p8), %s1384_s9, 5  ;;  %s265_s7 = scalar_lea.sflag (!%p1338_p8), [#allocation3], %s1384_s9 }
  0x2a   : > { %s1391_s13 = scalar_lea.vmem (!%p1338_p8), [#allocation2], %s1387_s12 }
  0x2b   : > { %1214 = dma.done.wait (%p1325_p4), %s265_s7, 512  }
  0x2c   : > { %1216 = vsyncadd (%p1325_p4), %s265_s7, 4294966784  ;;  %s274_s2 = sand.u32 1, %s1316_s21   ;;  %s1399_s19 = scalar_lea.vmem [#allocation5], %s1387_s12 }
  0x2d   : > { %s275_s17 = scalar_lea.sflag [#allocation6], %s274_s2 }
  0x2e   : > { %1218 = dma.done.wait (%p1325_p4), %s275_s17, 512  }
  0x2f   : > { %1220 = vsyncadd (%p1325_p4), %s275_s17, 4294966784 }
  0x30   : > { %1222 = dma.done.wait (%p56_p1), [#allocation6], 4096  }
  0x31   : > { %1224 = vsyncadd (%p56_p1), [#allocation6], 4294963200  ;;  %v865_v0 = vld [vmem:[#allocation7 + $0x70] sm:$0xf]  ;;  %v960_v1 = vld [vmem:[#allocation7 + $0x74] sm:$0xf0] }
  0x32   : > { %v929_v2 = vld [vmem:[#allocation7 + $0xf0] sm:$0xf]  ;;  %v866_v3 = vor.u32 %v960_v1, %v865_v0  ;;  %v976_v4 = vld [vmem:[#allocation7 + $0xf4] sm:$0xf0]  ;;  %v959_v5 = vld [vmem:[#allocation7 + $0x74] sm:$0xf] }
  0x33   : > { %v867_v6 = vld [vmem:[#allocation7 + $0x78] sm:$0xf0]  ;;  %v930_v7 = vor.u32 %v976_v4, %v929_v2  ;;  %v975_v9 = vld [vmem:[#allocation7 + $0xf4] sm:$0xf]  ;;  %v857_v11 = vld [vmem:[#allocation7 + $0x60] sm:$0xf] }
  0x34   : > { %v870_v8 = vor.u32 %v959_v5, %v867_v6  ;;  %v931_v10 = vld [vmem:[#allocation7 + $0xf8] sm:$0xf0]  ;;  %533 = vmatpush.bf16.msra.mxu0 %v866_v3  ;;  %v958_v13 = vld [vmem:[#allocation7 + $0x64] sm:$0xf0]  ;;  %v921_v14 = vld [vmem:[#allocation7 + $0xe0] sm:$0xf] }
  0x35   : > { %v934_v12 = vor.u32 %v975_v9, %v931_v10  ;;  %v974_v15 = vld [vmem:[#allocation7 + $0xe4] sm:$0xf0]  ;;  %547 = vmatpush.bf16.msra.mxu1 %v930_v7  ;;  %v858_v16 = vor.u32 %v958_v13, %v857_v11  ;;  %v957_v18 = vld [vmem:[#allocation7 + $0x64] sm:$0xf]  ;;  %v859_v19 = vld [vmem:[#allocation7 + $0x68] sm:$0xf0] }
  0x36   : > { %561 = vmatpush.bf16.msra.mxu2 %v870_v8  ;;  %v922_v17 = vor.u32 %v974_v15, %v921_v14  ;;  %v973_v20 = vld [vmem:[#allocation7 + $0xe4] sm:$0xf]  ;;  %v862_v21 = vor.u32 %v957_v18, %v859_v19  ;;  %v923_v22 = vld [vmem:[#allocation7 + $0xe8] sm:$0xf0]  ;;  %v849_v23 = vld [vmem:[#allocation7 + $0x50] sm:$0xf] }
  0x37   : > { %575 = vmatpush.bf16.msra.mxu3 %v934_v12  ;;  %v956_v24 = vld [vmem:[#allocation7 + $0x54] sm:$0xf0]  ;;  %v926_v25 = vor.u32 %v973_v20, %v923_v22  ;;  %v913_v26 = vld [vmem:[#allocation7 + $0xd0] sm:$0xf]  ;;  %v955_v28 = vld [vmem:[#allocation7 + $0x54] sm:$0xf] }
  0x38   : > { %v972_v27 = vld [vmem:[#allocation7 + $0xd4] sm:$0xf0]  ;;  %534 = vmatpush.bf16.msra.mxu0 %v858_v16  ;;  %v850_v29 = vor.u32 %v956_v24, %v849_v23  ;;  %v851_v30 = vld [vmem:[#allocation7 + $0x58] sm:$0xf0]  ;;  %v971_v31 = vld [vmem:[#allocation7 + $0xd4] sm:$0xf] }
  0x39   : > { %v915_v32 = vld [vmem:[#allocation7 + $0xd8] sm:$0xf0]  ;;  %548 = vmatpush.bf16.msra.mxu1 %v922_v17  ;;  %v914_v33 = vor.u32 %v972_v27, %v913_v26  ;;  %v854_v34 = vor.u32 %v955_v28, %v851_v30  ;;  %v841_v35 = vld [vmem:[#allocation7 + $0x40] sm:$0xf]  ;;  %v954_v36 = vld [vmem:[#allocation7 + $0x44] sm:$0xf0] }
  0x3a   : > { %562 = vmatpush.bf16.msra.mxu2 %v862_v21  ;;  %v905_v37 = vld [vmem:[#allocation7 + $0xc0] sm:$0xf]  ;;  %v918_v38 = vor.u32 %v971_v31, %v915_v32  ;;  %v970_v39 = vld [vmem:[#allocation7 + $0xc4] sm:$0xf0]  ;;  %v953_v40 = vld [vmem:[#allocation7 + $0x44] sm:$0xf]  ;;  %v842_v44 = vor.u32 %v954_v36, %v841_v35 }
  0x3b   : > { %576 = vmatpush.bf16.msra.mxu3 %v926_v25  ;;  %v843_v41 = vld [vmem:[#allocation7 + $0x48] sm:$0xf0]  ;;  %v969_v42 = vld [vmem:[#allocation7 + $0xc4] sm:$0xf]  ;;  %v906_v45 = vor.u32 %v970_v39, %v905_v37  ;;  %v833_v47 = vld [vmem:[#allocation7 + $0x30] sm:$0xf] }
  0x3c   : > { %v907_v43 = vld [vmem:[#allocation7 + $0xc8] sm:$0xf0]  ;;  %535 = vmatpush.bf16.msra.mxu0 %v850_v29  ;;  %v846_v46 = vor.u32 %v953_v40, %v843_v41  ;;  %v952_v48 = vld [vmem:[#allocation7 + $0x34] sm:$0xf0]  ;;  %v897_v49 = vld [vmem:[#allocation7 + $0xb0] sm:$0xf] }
  0x3d   : > { %549 = vmatpush.bf16.msra.mxu1 %v914_v33  ;;  %v910_v50 = vor.u32 %v969_v42, %v907_v43  ;;  %v968_v51 = vld [vmem:[#allocation7 + $0xb4] sm:$0xf0]  ;;  %v951_v52 = vld [vmem:[#allocation7 + $0x34] sm:$0xf]  ;;  %v835_v53 = vld [vmem:[#allocation7 + $0x38] sm:$0xf0]  ;;  %v834_v56 = vor.u32 %v952_v48, %v833_v47 }
  0x3e   : > { %563 = vmatpush.bf16.msra.mxu2 %v854_v34  ;;  %v967_v54 = vld [vmem:[#allocation7 + $0xb4] sm:$0xf]  ;;  %v899_v55 = vld [vmem:[#allocation7 + $0xb8] sm:$0xf0]  ;;  %v898_v57 = vor.u32 %v968_v51, %v897_v49  ;;  %v838_v58 = vor.u32 %v951_v52, %v835_v53  ;;  %v825_v59 = vld [vmem:[#allocation7 + $0x20] sm:$0xf] }
  0x3f   : > { %577 = vmatpush.bf16.msra.mxu3 %v918_v38  ;;  %v950_v60 = vld [vmem:[#allocation7 + $0x24] sm:$0xf0]  ;;  %v889_v61 = vld [vmem:[#allocation7 + $0xa0] sm:$0xf]  ;;  %v902_v62 = vor.u32 %v967_v54, %v899_v55  ;;  %v949_v0 = vld [vmem:[#allocation7 + $0x24] sm:$0xf] }
  0x40   : > { %536 = vmatpush.bf16.msra.mxu0 %v842_v44  ;;  %v966_v63 = vld [vmem:[#allocation7 + $0xa4] sm:$0xf0]  ;;  %v827_v1 = vld [vmem:[#allocation7 + $0x28] sm:$0xf0]  ;;  %v965_v2 = vld [vmem:[#allocation7 + $0xa4] sm:$0xf]  ;;  %v826_v4 = vor.u32 %v950_v60, %v825_v59 }
  0x41   : > { %550 = vmatpush.bf16.msra.mxu1 %v906_v45  ;;  %v891_v3 = vld [vmem:[#allocation7 + $0xa8] sm:$0xf0]  ;;  %v890_v5 = vor.u32 %v966_v63, %v889_v61  ;;  %v830_v6 = vor.u32 %v949_v0, %v827_v1  ;;  %v817_v7 = vld [vmem:[#allocation7 + $0x10] sm:$0xf]  ;;  %v948_v8 = vld [vmem:[#allocation7 + $0x14] sm:$0xf0] }
  0x42   : > { %564 = vmatpush.bf16.msra.mxu2 %v846_v46  ;;  %v881_v9 = vld [vmem:[#allocation7 + $0x90] sm:$0xf]  ;;  %v894_v10 = vor.u32 %v965_v2, %v891_v3  ;;  %v964_v11 = vld [vmem:[#allocation7 + $0x94] sm:$0xf0]  ;;  %v947_v12 = vld [vmem:[#allocation7 + $0x14] sm:$0xf]  ;;  %v818_v16 = vor.u32 %v948_v8, %v817_v7 }
  0x43   : > { %578 = vmatpush.bf16.msra.mxu3 %v910_v50  ;;  %v819_v13 = vld [vmem:[#allocation7 + $0x18] sm:$0xf0]  ;;  %v963_v14 = vld [vmem:[#allocation7 + $0x94] sm:$0xf]  ;;  %v882_v17 = vor.u32 %v964_v11, %v881_v9  ;;  %v809_v19 = vld [vmem:[#allocation7] sm:$0xf] }
  0x44   : > { %537 = vmatpush.bf16.msra.mxu0 %v834_v56  ;;  %v883_v15 = vld [vmem:[#allocation7 + $0x98] sm:$0xf0]  ;;  %v822_v18 = vor.u32 %v947_v12, %v819_v13  ;;  %v946_v20 = vld [vmem:[#allocation7 + $0x4] sm:$0xf0]  ;;  %v873_v21 = vld [vmem:[#allocation7 + $0x80] sm:$0xf] }
  0x45   : > { %551 = vmatpush.bf16.msra.mxu1 %v898_v57  ;;  %v886_v22 = vor.u32 %v963_v14, %v883_v15  ;;  %v962_v23 = vld [vmem:[#allocation7 + $0x84] sm:$0xf0]  ;;  %v945_v24 = vld [vmem:[#allocation7 + $0x4] sm:$0xf]  ;;  %v811_v25 = vld [vmem:[#allocation7 + $0x8] sm:$0xf0]  ;;  %v810_v28 = vor.u32 %v946_v20, %v809_v19 }
  0x46   : > { %565 = vmatpush.bf16.msra.mxu2 %v838_v58  ;;  %v961_v26 = vld [vmem:[#allocation7 + $0x84] sm:$0xf]  ;;  %v875_v27 = vld [vmem:[#allocation7 + $0x88] sm:$0xf0]  ;;  %v1411_v30 = vld [vmem:[%s1391_s13 + $0x10] sm:$0xff]  ;;  %v874_v31 = vor.u32 %v962_v23, %v873_v21  ;;  %v814_v32 = vor.u32 %v945_v24, %v811_v25  ;;  %s317_s28 = scalar_lea.vmem [#allocation8], %s1387_s12 }
  0x47   : > { %579 = vmatpush.bf16.msra.mxu3 %v902_v62  ;;  %v329_v29 = vld [vmem:[%s1391_s13] sm:$0xff]  ;;  %v1414_v33 = vld [vmem:[%s1391_s13 + $0x8] sm:$0xff]  ;;  %v1417_v34 = vld [vmem:[%s1391_s13 + $0x18] sm:$0xff]  ;;  %v878_v35 = vor.u32 %v961_v26, %v875_v27  ;;  %s978_s14 = sshll.u32 %s1243_s18, 5  ;;  %s650_s18 = sshll.u32 %s317_s28, 4  ;;  %s651_s18 = int_to_ptr.vmem [resolvable:$true] %s650_s18 }
  0x48   : > { %538 = vmatpush.bf16.msra.mxu0 %v826_v4  ;;  %v333_v36 = vpack.c.bf16 %v1411_v30, %v329_v29  ;;  %v334_v37 = vpack.c.bf16 %v1417_v34, %v1414_v33  ;;  %v367_v38 = vld [vmem:[%s1477_s3] sm:$0x3]  ;;  %v615_v1 = vld [vmem:[%s1399_s19 + $0x8] sm:$0xff]  ;;  %v616_v3 = vld [vmem:[%s1399_s19 + $0x10] sm:$0xff]  ;;  %s649_s30 = scalar_lea.hbm %s1478_s4, %s978_s14  ;;  %s635_s6 = scalar_lea.sflag [#allocation4], %s1384_s9 }
  0x49   : > { %552 = vmatpush.bf16.msra.mxu1 %v890_v5  ;;  %v369_v39 = vperm.slane %v367_v38, 0  ;;  %v370_v44 = vperm.slane %v367_v38, 1  ;;  %v614_v53 = vld [vmem:[%s1399_s19] sm:$0xff]  ;;  %v619_v9 = vsub.f32 %v615_v1, %v1414_v33  ;;  %v620_v11 = vsub.f32 %v616_v3, %v1411_v30  ;;  %s652_s5 = sshll.u32 %s649_s30, 4  ;;  %s1181_s29 = scalar_lea.hbm %s1478_s4, 64  ;;  %s653_s5 = int_to_ptr.hbm [resolvable:$true] %s652_s5 }
  0x4a   : > { %566 = vmatpush.bf16.msra.mxu2 %v830_v6  ;;  %v618_v59 = vsub.f32 %v614_v53, %v329_v29  ;;  %s1175_s11 = sshra.s32 %s653_s5, 4  ;;  %s1176_s11 = int_to_ptr.hbm [resolvable:$true] %s1175_s11 }
  0x4b   : > { %580 = vmatpush.bf16.msra.mxu3 %v894_v10  ;;  %s1177_s8 = scalar_lea.hbm %s1176_s11, 32  ;;  %p1182_p10 = scmp.lt.s32.totalorder %s1176_s11, %s1478_s4 }
  0x4c   : > { %539 = vmatpush.bf16.msra.mxu0 %v818_v16  ;;  %v617_v16 = vld [vmem:[%s1399_s19 + $0x18] sm:$0xff]  ;;  %p1178_p1 = scmp.ne.s32.totalorder %s1176_s11, %s1177_s8  ;;  %p1183_p12 = scmp.lt.s32.totalorder %s1181_s29, %s1177_s8 }
  0x4d   : > { %553 = vmatpush.bf16.msra.mxu1 %v882_v17  ;;  %v621_v21 = vsub.f32 %v617_v16, %v1417_v34 }
  0x4e   : > { %567 = vmatpush.bf16.msra.mxu2 %v822_v18  ;;  %p1179_p4 = pnand %p1178_p1, %p1360_p5  ;;  %p1184_p13 = por %p1183_p12, %p1182_p10 }
  0x4f   : > { %581 = vmatpush.bf16.msra.mxu3 %v886_v22 }
  0x50   : > { %540 = vmatpush.bf16.msra.mxu0 %v810_v28  ;;  %p1180_p8 = pneg %p1179_p4 }
  0x51   : > { %554 = vmatpush.bf16.msra.mxu1 %v874_v31 }
  0x52   : > { %568 = vmatpush.bf16.msra.mxu2 %v814_v32  ;;  %p1185_p0 = pnand %p1184_p13, %p1180_p8 }
  0x53   : > { %582 = vmatpush.bf16.msra.mxu3 %v878_v35  ;;  %541 = vmatmul.bf16.vlgmr.msra.gmra.mxu0 %v333_v36 }
  0x54   : > { %555 = vmatmul.bf16.vlgmr.msra.gmra.mxu1 %v334_v37 }
  0x55   : > { %569 = vmatmul.bf16.vlgmr.msra.gmra.mxu2 %v333_v36 }
  0x56   : > { %583 = vmatmul.bf16.vlgmr.msra.gmra.mxu3 %v334_v37 }
  0xd0   : > { %v542_v40 = vpop.f32.mrf.mxu0 }
  0xd1   : > { %v543_v41 = vadd.f32 %v542_v40, %v369_v39  ;;  %v556_v42 = vpop.f32.mrf.mxu1 }
  0xd3   : > { %v557_v43 = vadd.f32 %v556_v42, %v543_v41 }
  0xd5   : > { %v589_v45 = vmul.f32 0.5, %v557_v43 }
  0xd7   : > { %1063 = vtanh.f32 %v589_v45 }
  0xd8   : > { %v570_v46 = vpop.f32.mrf.mxu2  ;;  %v544_v49 = vpop.f32.mrf.mxu0 }
  0xd9   : > { %v571_v47 = vadd.f32 %v570_v46, %v370_v44  ;;  %v584_v48 = vpop.f32.mrf.mxu3  ;;  %v545_v50 = vadd.f32 %v544_v49, %v369_v39  ;;  %v558_v52 = vpop.f32.mrf.mxu1 }
  0xdb   : > { %v585_v51 = vadd.f32 %v584_v48, %v571_v47  ;;  %v559_v54 = vadd.f32 %v558_v52, %v545_v50 }
  0xdd   : > { %v590_v55 = vmul.f32 0.5, %v585_v51  ;;  %v1064_v56 = vpop.eup %1063  ;;  %v591_v57 = vmul.f32 0.5, %v559_v54 }
  0xde   : > { %v597_v58 = vmul.f32 0.5, %v1064_v56 }
  0xdf   : > { %1065 = vtanh.f32 %v590_v55 }
  0xe0   : > { %1067 = vtanh.f32 %v591_v57  ;;  %v572_v60 = vpop.f32.mrf.mxu2  ;;  %v601_v61 = vadd.f32 0.5, %v597_v58 }
  0xe1   : > { %v573_v62 = vadd.f32 %v572_v60, %v370_v44  ;;  %v586_v63 = vpop.f32.mrf.mxu3 }
  0xe2   : > { %v622_v0 = vmul.f32 %v618_v59, %v601_v61 }
  0xe3   : > { %v587_v2 = vadd.f32 %v586_v63, %v573_v62 }
  0xe4   : > { %v626_v5 = vadd.f32 %v622_v0, %v329_v29 }
  0xe5   : > { %v1066_v4 = vpop.eup %1065  ;;  %v592_v6 = vmul.f32 0.5, %v587_v2 }
  0xe6   : > { %v1068_v7 = vpop.eup %1067  ;;  %v598_v8 = vmul.f32 0.5, %v1066_v4  ;;  %630 = vst [vmem:[%s317_s28] sm:$0xff] %v626_v5 }
  0xe7   : > { %v599_v10 = vmul.f32 0.5, %v1068_v7  ;;  %1069 = vtanh.f32 %v592_v6 }
  0xe8   : > { %v602_v12 = vadd.f32 0.5, %v598_v8 }
  0xe9   : > { %v603_v13 = vadd.f32 0.5, %v599_v10 }
  0xea   : > { %v623_v14 = vmul.f32 %v619_v9, %v602_v12 }
  0xeb   : > { %v624_v15 = vmul.f32 %v620_v11, %v603_v13 }
  0xec   : > { %v627_v17 = vadd.f32 %v623_v14, %v1414_v33 }
  0xed   : > { %v1070_v18 = vpop.eup %1069  ;;  %v628_v19 = vadd.f32 %v624_v15, %v1411_v30 }
  0xee   : > { %631 = vst [vmem:[%s317_s28 + $0x8] sm:$0xff] %v627_v17  ;;  %v600_v20 = vmul.f32 0.5, %v1070_v18 }
  0xef   : > { %632 = vst [vmem:[%s317_s28 + $0x10] sm:$0xff] %v628_v19 }
  0xf0   : > { %v604_v22 = vadd.f32 0.5, %v600_v20 }
  0xf2   : > { %v625_v23 = vmul.f32 %v621_v21, %v604_v22 }
  0xf4   : > { %v629_v24 = vadd.f32 %v625_v23, %v1417_v34 }
  0xf6   : > { %633 = vst [vmem:[%s317_s28 + $0x18] sm:$0xff] %v629_v24 }
  0xf7   : > { %1188 = shalt.err (!%p1185_p0)
}
  0xf8   : > { %s1258_s9 = smov 256   ;;  %s1259_s13 = smov 16  }
  0xf9   : > { %987 = dma.vmem_to_hbm [thread:$0]  (%p1360_p5), %s651_s18, 512, %s653_s5, %s635_s6, %s1258_s9, %s1258_s9, %s1259_s13  }
  0xfa PF: > { %s667_s2 = sand.u32 1, %s1231_s15   ;;  %p1001_p3 = pnand %p793_p11, %p1330_p6 }
  0xfb   : > { %s668_s17 = scalar_lea.sflag [#allocation4], %s667_s2 }
  0xfc   : > { %p1002_p7 = pneg %p1001_p3 }
  0xfe   : > { %1226 = dma.done.wait (%p1002_p7), %s668_s17, 512  }
  0xff   : > { %1228 = vsyncadd (%p1002_p7), %s668_s17, 4294966784  ;;  %s23_s20 = sadd.s32 1, %s1251_s20   ;;  %s1493_s19 = sld [smem:[#allocation13_spill]] }
 0x100   : > { %p20_p9 = scmp.ge.s32.totalorder %s23_s20, 4   ;;  %s1494_s17 = sld [smem:[#allocation16_spill]] }
 0x101   : > { %s1495_s18 = sld [smem:[#allocation14_spill]]  ;;  %s1497_s15 = smov %s1235_s16 }
 0x102   : > { %s1496_s10 = sld [smem:[#allocation15_spill]] }
 0x104   :  { %22 = sbr.rel (!%p20_p9) target bundleno = 10 (0xa), region = 103 }
 0x105   : > { %s1498_s16 = smov %s1493_s19 }
 0x108   : > { %s1499_s19 = smov %s1496_s10 }
 0x109   :  { %674 = vsyncpa [#allocation3], 1 }
 0x10a   :  { %676 = vsyncpa [#allocation3 + $0x1], 1 }
 0x10b   :  { %677 = vsyncpa [#allocation6], 1 }
 0x10c   :  { %679 = vsyncpa [#allocation6 + $0x1], 1 }
 0x10d   :  { %680 = vsyncpa [#allocation4], 1 }
 0x10e   :  { %682 = vsyncpa [#allocation4 + $0x1], 1 }

</bundles_post_ra>
